<compile_context>
chip_gen: v5e
topology: v5e:2x2
jax: 0.10.0
libtpu: 0.0.40
codegen_flags: <defaults>
</compile_context>

<pallas_src>
import functools

import jax
import jax.numpy as jnp
from jax.experimental import pallas as pl
from jax.experimental.pallas import tpu as pltpu


# ---------------------------------------------------------------------------
# Tiling helpers
# ---------------------------------------------------------------------------
_TM_CAP = 256   # batch-tile cap (multiple of 8 sublanes)
_TN_CAP = 256   # out-feature-tile cap (multiple of 128 lanes)
_TK_CAP = 512   # contraction-tile cap (multiple of 128)


def _round_up(x, m):
    return ((x + m - 1) // m) * m


def _pick_tiles(M, N, K):
    tm = min(_TM_CAP, _round_up(M, 8))
    tn = min(_TN_CAP, _round_up(N, 128))
    tk = min(_TK_CAP, _round_up(K, 128))
    return tm, tn, tk


# ---------------------------------------------------------------------------
# Kernels
# ---------------------------------------------------------------------------
def _matmul_bias_relu_kernel(x_ref, wt_ref, b_ref, o_ref, acc_ref):
    """grid = (M//tm, N//tn, K//tk); acc_ref is the resident f32 accumulator."""
    k = pl.program_id(2)

    @pl.when(k == 0)
    def _():
        acc_ref[...] = jnp.zeros_like(acc_ref)

    # Straight (tm,tk) @ (tk,tn) MXU matmul -- weight pre-transposed in the wrapper.
    acc_ref[...] += jnp.dot(x_ref[...], wt_ref[...],
                            preferred_element_type=jnp.float32)

    @pl.when(k == pl.num_programs(2) - 1)
    def _():
        y = acc_ref[...] + b_ref[...]            # (tm,tn) + (1,tn)
        o_ref[...] = jnp.maximum(y, 0.0).astype(o_ref.dtype)


def _matmul_bias_relu_bn_kernel(x_ref, wt_ref, b_ref, g_ref, beta_ref,
                                o_ref, acc_ref, *, n_valid):
    """BN path: grid = (N//tn, K//tk); batch axis is fully resident (NOT tiled) so
    BatchNorm1d statistics remain true whole-batch statistics. Padded batch rows
    are masked out of the stats; stats use a fused one-pass sum / sum-of-squares."""
    k = pl.program_id(1)

    @pl.when(k == 0)
    def _():
        acc_ref[...] = jnp.zeros_like(acc_ref)

    acc_ref[...] += jnp.dot(x_ref[...], wt_ref[...],
                            preferred_element_type=jnp.float32)

    @pl.when(k == pl.num_programs(1) - 1)
    def _():
        y = jnp.maximum(acc_ref[...] + b_ref[...], 0.0)          # (B_pad, tn)
        # Exclude padded batch rows from the statistics.
        rows = jax.lax.broadcasted_iota(jnp.int32, y.shape, 0)
        mask = (rows < n_valid).astype(jnp.float32)
        ym = y * mask
        inv_n = 1.0 / n_valid
        s = jnp.sum(ym, axis=0, keepdims=True)
        ss = jnp.sum(ym * ym, axis=0, keepdims=True)
        mean = s * inv_n
        var = jnp.maximum(ss * inv_n - mean * mean, 0.0)          # biased var (÷N)
        inv = jax.lax.rsqrt(var + 1e-5)                           # EUP
        o_ref[...] = ((y - mean) * inv * g_ref[...] + beta_ref[...]).astype(o_ref.dtype)


# ---------------------------------------------------------------------------
# Wrapper
# ---------------------------------------------------------------------------
def linear_layer_forward(x, w, b, gamma=None, beta=None, use_bn=False,
                         compute_dtype=jnp.float32):
    """Pallas forward pass of LinearLayer.

    x: (B, input_dim) f32
    w: (output_dim, input_dim) f32   (PyTorch nn.Linear convention)
    b: (output_dim,) f32
    gamma, beta: (output_dim,) f32   (required when use_bn=True)
    compute_dtype: jnp.float32 or jnp.bfloat16 (MXU feed dtype; accumulation stays f32)
    """
    M, K = x.shape
    N, K2 = w.shape
    assert K == K2, "weight / input dim mismatch"

    tm, tn, tk = _pick_tiles(M, N, K)
    N_pad = _round_up(N, tn)
    K_pad = _round_up(K, tk)

    # Pre-transpose + pad weight ONCE in HBM (removes in-kernel .T relayout).
    wt = jnp.pad(w.T, ((0, K_pad - K), (0, N_pad - N))).astype(compute_dtype)
    b2 = jnp.pad(b.reshape(1, N), ((0, 0), (0, N_pad - N))).astype(jnp.float32)

    if not use_bn:
        M_pad = _round_up(M, tm)
        x_p = jnp.pad(x, ((0, M_pad - M), (0, K_pad - K))).astype(compute_dtype)
        grid = (M_pad // tm, N_pad // tn, K_pad // tk)

        itemsize = jnp.dtype(compute_dtype).itemsize
        cost = pl.CostEstimate(
            flops=2 * M_pad * N_pad * K_pad,
            transcendentals=0,
            bytes_accessed=(M_pad * K_pad + K_pad * N_pad) * itemsize
                           + (M_pad * N_pad + N_pad) * 4,
        )

        out = pl.pallas_call(
            _matmul_bias_relu_kernel,
            out_shape=jax.ShapeDtypeStruct((M_pad, N_pad), x.dtype),
            grid_spec=pltpu.PrefetchScalarGridSpec(
                num_scalar_prefetch=0,
                grid=grid,
                in_specs=[
                    pl.BlockSpec((tm, tk), lambda i, j, k: (i, k)),
                    pl.BlockSpec((tk, tn), lambda i, j, k: (k, j)),
                    pl.BlockSpec((1, tn), lambda i, j, k: (0, j)),
                ],
                out_specs=pl.BlockSpec((tm, tn), lambda i, j, k: (i, j)),
                scratch_shapes=[pltpu.VMEM((tm, tn), jnp.float32)],
            ),
            compiler_params=pltpu.CompilerParams(
                dimension_semantics=("parallel", "parallel", "arbitrary")),
            cost_estimate=cost,
        )(x_p, wt, b2)
        return out[:M, :N]

    # --------------------------- BN path -----------------------------------
    if gamma is None or beta is None:
        raise ValueError("use_bn=True requires gamma and beta")

    # Batch axis stays fully resident (NOT tiled) so stats are whole-batch.
    M_pad = _round_up(M, 8)
    x_p = jnp.pad(x, ((0, M_pad - M), (0, K_pad - K))).astype(compute_dtype)
    g2 = jnp.pad(gamma.reshape(1, N), ((0, 0), (0, N_pad - N)),
                 constant_values=1.0).astype(jnp.float32)
    beta2 = jnp.pad(beta.reshape(1, N), ((0, 0), (0, N_pad - N))).astype(jnp.float32)

    grid = (N_pad // tn, K_pad // tk)
    kernel = functools.partial(_matmul_bias_relu_bn_kernel, n_valid=M)

    itemsize = jnp.dtype(compute_dtype).itemsize
    cost = pl.CostEstimate(
        flops=2 * M_pad * N_pad * K_pad + 6 * M_pad * N_pad,
        transcendentals=N_pad,
        bytes_accessed=(M_pad * K_pad + K_pad * N_pad) * itemsize
                       + (M_pad * N_pad + 3 * N_pad) * 4,
    )

    out = pl.pallas_call(
        kernel,
        out_shape=jax.ShapeDtypeStruct((M_pad, N_pad), x.dtype),
        grid_spec=pltpu.PrefetchScalarGridSpec(
            num_scalar_prefetch=0,
            grid=grid,
            in_specs=[
                pl.BlockSpec((M_pad, tk), lambda j, k: (0, k)),
                pl.BlockSpec((tk, tn), lambda j, k: (k, j)),
                pl.BlockSpec((1, tn), lambda j, k: (0, j)),
                pl.BlockSpec((1, tn), lambda j, k: (0, j)),
                pl.BlockSpec((1, tn), lambda j, k: (0, j)),
            ],
            out_specs=pl.BlockSpec((M_pad, tn), lambda j, k: (0, j)),
            scratch_shapes=[pltpu.VMEM((M_pad, tn), jnp.float32)],
        ),
        compiler_params=pltpu.CompilerParams(
            dimension_semantics=("parallel", "arbitrary")),
        cost_estimate=cost,
    )(x_p, wt, b2, g2, beta2)
    return out[:M, :N]


# ---------------------------------------------------------------------------
# Demo / correctness check
# ---------------------------------------------------------------------------
if __name__ == "__main__":
    B, input_dim, output_dim = 8, 32, 128

    key = jax.random.PRNGKey(0)
    kx, kw, kb = jax.random.split(key, 3)

    # PyTorch nn.Linear default init: U(-1/sqrt(in), 1/sqrt(in))
    bound = 1.0 / (input_dim ** 0.5)
    x = jax.random.normal(kx, (B, input_dim), dtype=jnp.float32)
    w = jax.random.uniform(kw, (output_dim, input_dim), dtype=jnp.float32,
                           minval=-bound, maxval=bound)
    b = jax.random.uniform(kb, (output_dim,), dtype=jnp.float32,
                           minval=-bound, maxval=bound)
    # BatchNorm1d init: gamma = 1, beta = 0
    gamma = jnp.ones((output_dim,), dtype=jnp.float32)
    beta = jnp.zeros((output_dim,), dtype=jnp.float32)

    # Default path (use_bn=False): relu(linear(x)) -- f32 MXU feed, tight check.
    out = jax.block_until_ready(linear_layer_forward(x, w, b, use_bn=False))
    ref = jnp.maximum(x @ w.T + b, 0.0)
    assert jnp.allclose(out, ref, atol=1e-5, rtol=1e-5)

    # BN path (use_bn=True): bn(relu(linear(x))) with whole-batch training statistics.
    out_bn = jax.block_until_ready(
        linear_layer_forward(x, w, b, gamma, beta, use_bn=True))
    y = jnp.maximum(x @ w.T + b, 0.0)
    mu = y.mean(axis=0, keepdims=True)
    var = ((y - mu) ** 2).mean(axis=0, keepdims=True)
    ref_bn = (y - mu) / jnp.sqrt(var + 1e-5) * gamma + beta
    assert jnp.allclose(out_bn, ref_bn, atol=1e-4, rtol=1e-4)

    # bf16 MXU-feed path (v6e/v7x performance option) -- f32 accumulation, looser check.
    out_bf16 = jax.block_until_ready(
        linear_layer_forward(x, w, b, use_bn=False, compute_dtype=jnp.bfloat16))
    assert jnp.allclose(out_bf16, ref, atol=5e-2, rtol=5e-2)

    print("KERNEL_OK")
</pallas_src>

<mosaic_0001>
module attributes {stable_mosaic.version = 11 : i64} {
  func.func @_matmul_bias_relu_kernel(%arg0: i32, %arg1: i32, %arg2: i32, %arg3: memref<8x128xf32, #tpu.memory_space<vmem>>, %arg4: memref<128x128xf32, #tpu.memory_space<vmem>>, %arg5: memref<1x128xf32, #tpu.memory_space<vmem>>, %arg6: memref<8x128xf32, #tpu.memory_space<vmem>>, %arg7: memref<8x128xf32, #tpu.memory_space<vmem>>) attributes {dimension_semantics = [#tpu.dimension_semantics<parallel>, #tpu.dimension_semantics<parallel>, #tpu.dimension_semantics<arbitrary>], iteration_bounds = array<i64: 1, 1, 1>, scalar_prefetch = 0 : i64, scratch_operands = 1 : i64, tpu.core_type = #tpu.core_type<tc>, window_params = [{transform_indices = @transform_0, window_bounds = array<i64: 8, 128>}, {transform_indices = @transform_1, window_bounds = array<i64: 128, 128>}, {transform_indices = @transform_2, window_bounds = array<i64: 1, 128>}, {transform_indices = @transform_3, window_bounds = array<i64: 8, 128>}]} {
    %c0_i32 = arith.constant 0 : i32
    %0 = arith.cmpi eq, %arg2, %c0_i32 : i32
    %1 = arith.extui %0 : i1 to i32
    %c0_i32_0 = arith.constant 0 : i32
    %2 = arith.cmpi ne, %1, %c0_i32_0 : i32
    scf.if %2 {
      %cst_10 = arith.constant 0.000000e+00 : f32
      %12 = vector.broadcast %cst_10 : f32 to vector<8x128xf32>
      %c0_11 = arith.constant 0 : index
      %c0_12 = arith.constant 0 : index
      %13 = vector.load %arg7[%c0_11, %c0_12] : memref<8x128xf32, #tpu.memory_space<vmem>>, vector<8x128xf32>
      tpu.vector_store %arg7[%c0_11, %c0_12], %12 {strides = array<i32>} : memref<8x128xf32, #tpu.memory_space<vmem>>, vector<8x128xf32>,
    } else {
    }
    %c0 = arith.constant 0 : index
    %c0_1 = arith.constant 0 : index
    %3 = vector.load %arg7[%c0, %c0_1] : memref<8x128xf32, #tpu.memory_space<vmem>>, vector<8x128xf32>
    %c0_2 = arith.constant 0 : index
    %c0_3 = arith.constant 0 : index
    %4 = vector.load %arg3[%c0_2, %c0_3] : memref<8x128xf32, #tpu.memory_space<vmem>>, vector<8x128xf32>
    %c0_4 = arith.constant 0 : index
    %c0_5 = arith.constant 0 : index
    %5 = vector.load %arg4[%c0_4, %c0_5] : memref<128x128xf32, #tpu.memory_space<vmem>>, vector<128x128xf32>
    %cst = arith.constant dense<0.000000e+00> : vector<8x128xf32>
    %6 = tpu.matmul %4, %5, %cst {dimension_numbers = #tpu.dot_dimension_numbers<[1], [0], [0], [1], [0, 0, 1, 1], [], []>} : vector<8x128xf32>, vector<128x128xf32>, vector<8x128xf32> -> vector<8x128xf32>
    %7 = arith.addf %3, %6 : vector<8x128xf32>
    %c0_6 = arith.constant 0 : index
    %c0_7 = arith.constant 0 : index
    %8 = vector.load %arg7[%c0_6, %c0_7] : memref<8x128xf32, #tpu.memory_space<vmem>>, vector<8x128xf32>
    tpu.vector_store %arg7[%c0_6, %c0_7], %7 {strides = array<i32>} : memref<8x128xf32, #tpu.memory_space<vmem>>, vector<8x128xf32>,
    %c0_i32_8 = arith.constant 0 : i32
    %9 = arith.cmpi eq, %arg2, %c0_i32_8 : i32
    %10 = arith.extui %9 : i1 to i32
    %c0_i32_9 = arith.constant 0 : i32
    %11 = arith.cmpi ne, %10, %c0_i32_9 : i32
    scf.if %11 {
      %c0_10 = arith.constant 0 : index
      %c0_11 = arith.constant 0 : index
      %12 = vector.load %arg7[%c0_10, %c0_11] : memref<8x128xf32, #tpu.memory_space<vmem>>, vector<8x128xf32>
      %c0_12 = arith.constant 0 : index
      %c0_13 = arith.constant 0 : index
      %13 = vector.load %arg5[%c0_12, %c0_13] : memref<1x128xf32, #tpu.memory_space<vmem>>, vector<1x128xf32>
      %14 = vector.broadcast %13 : vector<1x128xf32> to vector<8x128xf32>
      %15 = arith.addf %12, %14 : vector<8x128xf32>
      %cst_14 = arith.constant 0.000000e+00 : f32
      %16 = vector.broadcast %cst_14 : f32 to vector<8x128xf32>
      %17 = arith.maximumf %15, %16 : vector<8x128xf32>
      %c0_15 = arith.constant 0 : index
      %c0_16 = arith.constant 0 : index
      %18 = vector.load %arg6[%c0_15, %c0_16] : memref<8x128xf32, #tpu.memory_space<vmem>>, vector<8x128xf32>
      tpu.vector_store %arg6[%c0_15, %c0_16], %17 {strides = array<i32>} : memref<8x128xf32, #tpu.memory_space<vmem>>, vector<8x128xf32>,
    } else {
    }
    return
  }
  func.func @transform_0(%arg0: i32, %arg1: i32, %arg2: i32) -> (i32, i32) {
    %c0_i32 = arith.constant 0 : i32
    return %arg0, %arg2 : i32, i32
  }
  func.func @transform_1(%arg0: i32, %arg1: i32, %arg2: i32) -> (i32, i32) {
    %c0_i32 = arith.constant 0 : i32
    return %arg2, %arg1 : i32, i32
  }
  func.func @transform_2(%arg0: i32, %arg1: i32, %arg2: i32) -> (i32, i32) {
    %c0_i32 = arith.constant 0 : i32
    %c0_i32_0 = arith.constant 0 : i32
    return %c0_i32, %arg1 : i32, i32
  }
  func.func @transform_3(%arg0: i32, %arg1: i32, %arg2: i32) -> (i32, i32) {
    %c0_i32 = arith.constant 0 : i32
    return %arg0, %arg1 : i32, i32
  }
}

</mosaic_0001>

<bundles_post_ra>
// kernel: tpu_custom_call.1
= control target key start
LH: loop header
LB: loop body
LE: loop exit
PB: predicated region body
PF: predicated region fallthrough
CT: control target
= control target key end

     0   :  { %8 = vsyncpa [#allocation4], 0  ;;  %s240_s0 = inlined_call_operand.hbm [shape: f32[8,128], index: 0, kind: input, shape index: {}]   ;;  %s241_s1 = inlined_call_operand.hbm [shape: f32[128,128], index: 1, kind: input, shape index: {}]   ;;  %s242_s2 = inlined_call_operand.vmem [shape: f32[1,128], index: 2, kind: input, shape index: {}]   ;;  %s243_s3 = inlined_call_operand.hbm [shape: f32[8,128], index: 3, kind: output, shape index: {}]  }
   0x1   :  { %9 = vsyncpa [#allocation7], 0 }
   0x2   :  { %10 = vsyncpa [#allocation5], 0  ;;  %s16_s14 = sshll.u32 %s240_s0, 4  ;;  %s203_s15 = smov [#allocation3]   ;;  %s17_s14 = int_to_ptr.hbm [resolvable:$true] %s16_s14 }
   0x3   :  { %s18_s16 = sshll.u32 %s203_s15, 4  ;;  %s26_s19 = sshll.u32 %s241_s1, 4  ;;  %s19_s16 = int_to_ptr.vmem [resolvable:$true] %s18_s16  ;;  %s27_s19 = int_to_ptr.hbm [resolvable:$true] %s26_s19 }
   0x4   :  { %21 = dma.hbm_to_vmem [thread:$0]  %s17_s14, 128, %s19_s16, [#allocation4]  }
   0x5   :  { %s204_s20 = smov [#allocation6]   ;;  %s205_s22 = smov 128  }
   0x6   :  { %s28_s21 = sshll.u32 %s204_s20, 4  ;;  %s206_s23 = smov 8   ;;  %s29_s21 = int_to_ptr.vmem [resolvable:$true] %s28_s21 }
   0x7   :  { %34 = dma.hbm_to_vmem [thread:$0]  %s27_s19, 2048, %s29_s21, [#allocation7], %s205_s22, %s205_s22, %s206_s23  }
   0x8   :  { %197 = dma.done.wait [#allocation4], 128  }
   0x9   :  { %198 = vsyncadd [#allocation4], 4294967168 }
   0xa   :  { %199 = dma.done.wait [#allocation7], 2048  }
   0xb   :  { %200 = vsyncadd [#allocation7], 4294965248  ;;  %v67_v0 = vld [vmem:[#allocation6 + $0x78] sm:$0xff]  ;;  %v66_v1 = vld [vmem:[#allocation6 + $0x70] sm:$0xff]  ;;  %s207_s24 = smov [#allocation8]   ;;  %s108_s28 = sshll.u32 %s243_s3, 4  ;;  %s109_s28 = int_to_ptr.hbm [resolvable:$true] %s108_s28 }
   0xc   :  { %68 = vmatpush.msra.mxu0 %v67_v0  ;;  %v65_v2 = vld [vmem:[#allocation6 + $0x68] sm:$0xff]  ;;  %v64_v3 = vld [vmem:[#allocation6 + $0x60] sm:$0xff]  ;;  %v63_v4 = vld [vmem:[#allocation6 + $0x58] sm:$0xff]  ;;  %s106_s25 = sshll.u32 %s207_s24, 4  ;;  %s107_s25 = int_to_ptr.vmem [resolvable:$true] %s106_s25 }
   0xd   :  { %v62_v5 = vld [vmem:[#allocation6 + $0x50] sm:$0xff]  ;;  %v61_v6 = vld [vmem:[#allocation6 + $0x48] sm:$0xff]  ;;  %v60_v7 = vld [vmem:[#allocation6 + $0x40] sm:$0xff] }
   0xe   :  { %69 = vmatpush.msra.mxu0 %v66_v1  ;;  %v59_v8 = vld [vmem:[#allocation6 + $0x38] sm:$0xff]  ;;  %v58_v9 = vld [vmem:[#allocation6 + $0x30] sm:$0xff]  ;;  %v57_v10 = vld [vmem:[#allocation6 + $0x28] sm:$0xff] }
   0xf   :  { %v56_v11 = vld [vmem:[#allocation6 + $0x20] sm:$0xff]  ;;  %v55_v12 = vld [vmem:[#allocation6 + $0x18] sm:$0xff]  ;;  %v54_v13 = vld [vmem:[#allocation6 + $0x10] sm:$0xff] }
  0x10   :  { %70 = vmatpush.msra.mxu0 %v65_v2  ;;  %v53_v14 = vld [vmem:[#allocation6 + $0x8] sm:$0xff]  ;;  %v52_v15 = vld [vmem:[#allocation6] sm:$0xff]  ;;  %v51_v16 = vld [vmem:[#allocation3] sm:$0xff] }
  0x11   :  { %v124_v17 = vld [vmem:[%s242_s2] ss:$0 sm:$0xff] }
  0x12   :  { %71 = vmatpush.msra.mxu0 %v64_v3 }
  0x14   :  { %72 = vmatpush.msra.mxu0 %v63_v4 }
  0x16   :  { %73 = vmatpush.msra.mxu0 %v62_v5 }
  0x18   :  { %74 = vmatpush.msra.mxu0 %v61_v6 }
  0x1a   :  { %75 = vmatpush.msra.mxu0 %v60_v7 }
  0x1c   :  { %76 = vmatpush.msra.mxu0 %v59_v8 }
  0x1e   :  { %77 = vmatpush.msra.mxu0 %v58_v9 }
  0x20   :  { %78 = vmatpush.msra.mxu0 %v57_v10 }
  0x22   :  { %79 = vmatpush.msra.mxu0 %v56_v11 }
  0x24   :  { %80 = vmatpush.msra.mxu0 %v55_v12 }
  0x26   :  { %81 = vmatpush.msra.mxu0 %v54_v13 }
  0x28   :  { %82 = vmatpush.msra.mxu0 %v53_v14 }
  0x2a   :  { %83 = vmatpush.msra.mxu0 %v52_v15 }
  0x2b   :  { %84 = vmatmul.f32.vlgmr.msra.gmra.mxu0 %v51_v16 }
  0xa8   :  { %v85_v18 = vpop.f32.mrf.mxu0 }
  0xa9   :  { %v98_v19 = vadd.f32 %v124_v17, %v85_v18 }
  0xab   :  { %v99_v20 = vmax.f32 %v98_v19, 0.0 }
  0xad   :  { %100 = vst [vmem:[#allocation8] sm:$0xff] %v99_v20 }
  0xae   :  { %111 = dma.vmem_to_hbm [thread:$0]  %s107_s25, 128, %s109_s28, [#allocation5]  }
  0xaf   :  { %201 = dma.done.wait [#allocation5], 128  }
  0xb0   :  { %202 = vsyncadd [#allocation5], 4294967168 }
  0xb1   :  { %116 = vsyncpa [#allocation4], 1 }
  0xb2   :  { %117 = vsyncpa [#allocation7], 1 }
  0xb3   :  { %118 = vsyncpa [#allocation5], 1 }

</bundles_post_ra>
